<compile_context>
chip_gen: v7x
topology: tpu7x:2x2x1
jax: 0.10.0
libtpu: 0.0.40
codegen_flags: <defaults>
</compile_context>

<pallas_src>
import functools
import math

import jax
import jax.numpy as jnp
from jax import lax
from jax.experimental import pallas as pl
from jax.experimental.pallas import tpu as pltpu


def _round_up(v, m):
    return (v + m - 1) // m * m


def _cdiv(a, b):
    return (a + b - 1) // b


def _l2_normalize(t):
    ss = jnp.sum(t * t, axis=-1, keepdims=True)
    return t * lax.rsqrt(jnp.maximum(ss, 1e-24))


def _tpu_vmem_capacity_bytes():
    """Best-effort per-core VMEM capacity; conservative fallback."""
    try:
        info = pltpu.get_tpu_info()
        cap = getattr(info, "vmem_capacity_bytes", None)
        if cap:
            return int(cap)
    except Exception:
        pass
    try:
        kind = jax.devices()[0].device_kind.lower()
    except Exception:
        kind = ""
    if "v7" in kind:
        return 64 * 1024 * 1024
    if any(t in kind for t in ("v4", "v5", "v6")):
        return 128 * 1024 * 1024
    return 64 * 1024 * 1024       # unknown generation: be conservative


def _tensorcores_per_chip():
    try:
        kind = jax.devices()[0].device_kind.lower()
        if "v7" in kind:
            return 2
    except Exception:
        pass
    return 1


def _border_energy_kernel(x_ref, a_ref, b_ref, out_ref,
                          xn_ref, m_a_ref, l_a_ref, m_b_ref, l_b_ref, *,
                          n_a, n_b, tile_m, tile_n, num_n,
                          beta_a, beta_b, beta_border,
                          normalize, mask_diagonale):
    mi = pl.program_id(0)
    ni = pl.program_id(1)
    row0 = mi * tile_m          # global query-row offset of this tile
    col0 = ni * tile_n          # offset into the (padded) a / b pattern dim
    n_lane_chunks = tile_n // 128

    # ---- once per M tile: normalize x, reset the online-LSE accumulators ----
    @pl.when(ni == 0)
    def _init():
        x = x_ref[...]
        if normalize:
            xn_ref[...] = _l2_normalize(x.astype(jnp.float32)).astype(xn_ref.dtype)
        else:
            xn_ref[...] = x.astype(xn_ref.dtype)
        m_a_ref[...] = jnp.full_like(m_a_ref, -jnp.inf)
        m_b_ref[...] = jnp.full_like(m_b_ref, -jnp.inf)
        l_a_ref[...] = jnp.zeros_like(l_a_ref)
        l_b_ref[...] = jnp.zeros_like(l_b_ref)

    xn = xn_ref[...]            # [tile_m, F], stays resident across the N sweep

    def block_update(mem_ref, m_ref, l_ref, beta, n_valid, col_base):
        n_valid_blocks = _cdiv(n_valid, tile_n)

        def _compute():
            # NT matmul on the MXU: [tile_m, F] x [tile_n, F]^T -> [tile_m, tile_n]
            s = lax.dot_general(
                xn, mem_ref[...],
                dimension_numbers=(((1,), (1,)), ((), ())),
                preferred_element_type=jnp.float32)
            s = s * beta

            def _update(sv):
                # Lane-dense online LSE: 128-wide per-lane running max / sum-exp
                # (full-lane VPU ops); cross-lane reduce happens once in finalize.
                m_prev = m_ref[...]                               # (tile_m, 128)
                s_max = sv[:, 0:128]
                for c in range(1, n_lane_chunks):
                    s_max = jnp.maximum(s_max, sv[:, c * 128:(c + 1) * 128])
                m_new = jnp.maximum(m_prev, s_max)
                # -inf-safe: lanes whose entire slice is masked stay at -inf
                m_safe = jnp.where(m_new == -jnp.inf, 0.0, m_new)
                p_sum = jnp.exp(sv[:, 0:128] - m_safe)
                for c in range(1, n_lane_chunks):
                    p_sum = p_sum + jnp.exp(sv[:, c * 128:(c + 1) * 128] - m_safe)
                l_ref[...] = jnp.exp(m_prev - m_safe) * l_ref[...] + p_sum
                m_ref[...] = m_new

            # Does this tile contain masked entries (padding and/or diagonal)?
            conds = []
            if n_valid % tile_n != 0:                       # padded columns exist
                conds.append(ni == (n_valid // tile_n))     # ...only in this tile
            if mask_diagonale:
                cg0 = col_base + col0                        # global attn column origin
                conds.append(jnp.logical_and(cg0 < row0 + tile_m,
                                             row0 < cg0 + tile_n))

            if conds:
                need_mask = functools.reduce(jnp.logical_or, conds)

                @pl.when(need_mask)
                def _masked():
                    lc = col0 + lax.broadcasted_iota(
                        jnp.int32, (tile_m, tile_n), 1)
                    bad = None
                    if n_valid % tile_n != 0:
                        bad = lc >= n_valid                 # padded columns
                    if mask_diagonale:
                        r = row0 + lax.broadcasted_iota(
                            jnp.int32, (tile_m, tile_n), 0)
                        d = r == (col_base + lc)            # global diagonal
                        bad = d if bad is None else jnp.logical_or(bad, d)
                    _update(jnp.where(bad, -jnp.inf, s))

                @pl.when(jnp.logical_not(need_mask))
                def _clean():
                    _update(s)
            else:
                _update(s)

        if n_valid_blocks < num_n:
            # Shorter operand: its index_map repeats the last valid block for
            # ni >= n_valid_blocks (no redundant DMA); skip compute there.
            pl.when(ni < n_valid_blocks)(_compute)
        else:
            _compute()

    block_update(a_ref, m_a_ref, l_a_ref, beta_a, n_a, 0)
    block_update(b_ref, m_b_ref, l_b_ref, beta_b, n_b, n_a)

    # ---- finalize once per M tile ----
    @pl.when(ni == num_n - 1)
    def _finalize():
        def _row_lse(m_ref, l_ref):
            m_vec = m_ref[...]                                # (tile_m, 128)
            l_vec = l_ref[...]
            m_row = jnp.max(m_vec, axis=-1, keepdims=True)    # single XLU reduce
            m_row_safe = jnp.where(m_row == -jnp.inf, 0.0, m_row)
            l_row = jnp.sum(l_vec * jnp.exp(m_vec - m_row_safe),
                            axis=-1, keepdims=True)
            # fully-masked row => l_row == 0 => lse = -inf (explicit guard)
            return jnp.where(l_row > 0.0,
                             m_row_safe + jnp.log(jnp.maximum(l_row, 1e-45)),
                             -jnp.inf)

        inv_ba = 1.0 / beta_a
        inv_bb = 1.0 / beta_b
        inv_bd = 1.0 / beta_border

        lse_a = _row_lse(m_a_ref, l_a_ref)                    # [tile_m, 1]
        lse_b = _row_lse(m_b_ref, l_b_ref)
        a_energy = (math.log(n_a) - lse_a) * inv_ba           # -logmeanexp
        b_energy = (math.log(n_b) - lse_b) * inv_bb

        u = -beta_border * a_energy
        v = -beta_border * b_energy
        mx = jnp.maximum(u, v)
        mx_safe = jnp.where(mx == -jnp.inf, 0.0, mx)
        log_add = mx + jnp.log(jnp.exp(u - mx_safe) + jnp.exp(v - mx_safe))
        union = (math.log(2.0) - log_add) * inv_bd
        border = a_energy + b_energy - 2.0 * union            # [tile_m, 1]

        # lane-dense store: broadcast across 128 lanes, full unmasked vst
        out_ref[...] = jnp.broadcast_to(border, (tile_m, 128)).astype(out_ref.dtype)


def border_energy(x, a, b, *, beta_a, beta_b, beta_border,
                  normalize=True, mask_diagonale=True,
                  compute_dtype=jnp.bfloat16, tile_m=1024, tile_n=1024):
    """Pallas implementation of BorderEnergy.forward(x) (return_dict=False)."""
    x = jnp.asarray(x)
    a32 = jnp.asarray(a, jnp.float32)
    b32 = jnp.asarray(b, jnp.float32)
    if normalize:                       # buffers normalized once at __init__
        a32 = _l2_normalize(a32)
        b32 = _l2_normalize(b32)

    m, f = x.shape
    n_a, n_b = a32.shape[0], b32.shape[0]
    if mask_diagonale:
        assert m == n_a + n_b, "diagonal masking requires M == Na + Nb"

    isz = jnp.dtype(compute_dtype).itemsize

    # ---- tile sizing ------------------------------------------------------
    # tile_m multiple of 8 (sublanes), tile_n multiple of 128 (lanes);
    # clamp to the data size.
    tile_m = min(_round_up(tile_m, 8), _round_up(m, 8))
    tile_n = min(_round_up(tile_n, 128), _round_up(max(n_a, n_b), 128))

    # v7x megacore: keep >= 2 M tiles so the "parallel" M axis can split
    # across the two TensorCores.
    if _tensorcores_per_chip() > 1 and tile_m >= _round_up(m, 8):
        half = _round_up(_cdiv(m, 2), 8)
        if half < tile_m:
            tile_m = half

    # Per-generation VMEM budget: shrink tile_n first (tile_m sets arithmetic
    # intensity), then tile_m as a last resort.
    vmem_cap = _tpu_vmem_capacity_bytes()
    vmem_budget = int(vmem_cap * 0.85)

    def _vmem_estimate(tm, tn):
        inputs = 2 * (tm + 2 * tn) * f * isz        # double-buffered x, a, b
        outputs = 2 * tm * 128 * 4                   # double-buffered out slab
        scratch = tm * f * isz + 4 * tm * 128 * 4    # xn + lane-dense m/l accs
        inter = 2 * tm * tn * 4                      # score tile + exp temporaries
        return inputs + outputs + scratch + inter

    while _vmem_estimate(tile_m, tile_n) > vmem_budget and tile_n > 128:
        tile_n = max(128, _round_up(tile_n // 2, 128))
    while _vmem_estimate(tile_m, tile_n) > vmem_budget and tile_m > 8:
        tile_m = max(8, _round_up(tile_m // 2, 8))

    num_m = _cdiv(m, tile_m)
    num_n_a = _cdiv(n_a, tile_n)
    num_n_b = _cdiv(n_b, tile_n)
    num_n = max(num_n_a, num_n_b)
    m_pad = num_m * tile_m

    # a and b are padded only to their OWN block counts; the shorter one's
    # index_map clamps to its last block so fully-padded tiles are never
    # re-fetched from HBM (compute there is statically gated off in-kernel).
    x_p = jnp.pad(x.astype(compute_dtype), ((0, m_pad - m), (0, 0)))
    a_p = jnp.pad(a32.astype(compute_dtype), ((0, num_n_a * tile_n - n_a), (0, 0)))
    b_p = jnp.pad(b32.astype(compute_dtype), ((0, num_n_b * tile_n - n_b), (0, 0)))

    def _nmap(last_block):
        if last_block == num_n - 1:
            return lambda mi, ni: (ni, 0)
        return lambda mi, ni, _last=last_block: (jnp.minimum(ni, _last), 0)

    kernel = functools.partial(
        _border_energy_kernel,
        n_a=n_a, n_b=n_b, tile_m=tile_m, tile_n=tile_n, num_n=num_n,
        beta_a=float(beta_a), beta_b=float(beta_b),
        beta_border=float(beta_border),
        normalize=normalize, mask_diagonale=mask_diagonale)

    out = pl.pallas_call(
        kernel,
        out_shape=jax.ShapeDtypeStruct((m_pad, 128), jnp.float32),
        grid_spec=pltpu.PrefetchScalarGridSpec(
            num_scalar_prefetch=0,
            grid=(num_m, num_n),
            in_specs=[
                pl.BlockSpec((tile_m, f), lambda mi, ni: (mi, 0)),  # x: resident over N
                pl.BlockSpec((tile_n, f), _nmap(num_n_a - 1)),      # a tiles
                pl.BlockSpec((tile_n, f), _nmap(num_n_b - 1)),      # b tiles
            ],
            out_specs=pl.BlockSpec((tile_m, 128), lambda mi, ni: (mi, 0)),
            scratch_shapes=[
                pltpu.VMEM((tile_m, f), compute_dtype),    # normalized x
                pltpu.VMEM((tile_m, 128), jnp.float32),    # lane-dense running max (a)
                pltpu.VMEM((tile_m, 128), jnp.float32),    # lane-dense sum-exp (a)
                pltpu.VMEM((tile_m, 128), jnp.float32),    # lane-dense running max (b)
                pltpu.VMEM((tile_m, 128), jnp.float32),    # lane-dense sum-exp (b)
            ]),
        compiler_params=pltpu.CompilerParams(
            dimension_semantics=("parallel", "arbitrary"),
            vmem_limit_bytes=vmem_budget),
    )(x_p, a_p, b_p)

    return out[:m, 0]                   # border_energy: [M]


def _reference(x, a, b, *, beta_a, beta_b, beta_border, cast_dtype=None):
    """Pure-JAX reference mirroring the PyTorch code.

    If cast_dtype is given, inputs are rounded through that dtype at the same
    points the kernel's streaming path rounds them (for bf16 comparisons).
    """
    a = _l2_normalize(jnp.asarray(a, jnp.float32))
    b = _l2_normalize(jnp.asarray(b, jnp.float32))
    x = jnp.asarray(x, jnp.float32)
    if cast_dtype is not None:
        a = a.astype(cast_dtype).astype(jnp.float32)
        b = b.astype(cast_dtype).astype(jnp.float32)
        x = x.astype(cast_dtype).astype(jnp.float32)
    x = _l2_normalize(x)
    if cast_dtype is not None:
        x = x.astype(cast_dtype).astype(jnp.float32)

    attn = x @ jnp.concatenate([a, b], 0).T
    n = attn.shape[-1]
    attn = jnp.where(jnp.eye(n, dtype=bool), -jnp.inf, attn)
    lme = lambda beta, z, k: (jax.nn.logsumexp(beta * z, axis=-1) - jnp.log(k)) / beta
    ea = -lme(beta_a, attn[:, :a.shape[0]], a.shape[0])
    eb = -lme(beta_b, attn[:, a.shape[0]:], b.shape[0])
    union = (-1.0 / beta_border) * jnp.logaddexp(-beta_border * ea, -beta_border * eb) \
            + jnp.log(2.0) / beta_border
    return ea + eb - 2.0 * union


if __name__ == "__main__":
    key = jax.random.PRNGKey(0)
    k1, k2, k3, k4, k5, k6 = jax.random.split(key, 6)

    beta_a, beta_b, beta_border = 1.0, 1.5, 2.0

    # ---- small module-sized example ---------------------------------------
    F = 32        # hidden / feature dim
    N_A = 4       # stored a-patterns
    N_B = 4       # stored b-patterns
    M = N_A + N_B # queries (must equal Na+Nb since mask_diagonale=True)

    a = jax.random.normal(k1, (N_A, F), jnp.float32)
    b = jax.random.normal(k2, (N_B, F), jnp.float32)
    x = jax.random.normal(k3, (M, F), jnp.float32)

    # float32 streaming path: tight check against f32 reference
    out32 = border_energy(x, a, b,
                          beta_a=beta_a, beta_b=beta_b, beta_border=beta_border,
                          normalize=True, mask_diagonale=True,
                          compute_dtype=jnp.float32)
    out32 = jax.block_until_ready(out32)
    ref32 = _reference(x, a, b, beta_a=beta_a, beta_b=beta_b,
                       beta_border=beta_border)
    assert out32.shape == (M,)
    assert jnp.allclose(out32, ref32, atol=1e-4, rtol=1e-4), (out32, ref32)

    # default bf16 streaming path: check against bf16-matched reference
    outbf = border_energy(x, a, b,
                          beta_a=beta_a, beta_b=beta_b, beta_border=beta_border,
                          normalize=True, mask_diagonale=True)
    outbf = jax.block_until_ready(outbf)
    refbf = _reference(x, a, b, beta_a=beta_a, beta_b=beta_b,
                       beta_border=beta_border, cast_dtype=jnp.bfloat16)
    assert outbf.shape == (M,)
    assert jnp.allclose(outbf, refbf, atol=5e-3, rtol=5e-3), (outbf, refbf)

    # ---- multi-tile path: unequal n_a/n_b exercises the clamped index_map,
    # padding + diagonal masks across tiles, and multiple 128-lane chunks ----
    F2, N_A2, N_B2 = 48, 300, 100
    M2 = N_A2 + N_B2
    a2 = jax.random.normal(k4, (N_A2, F2), jnp.float32)
    b2 = jax.random.normal(k5, (N_B2, F2), jnp.float32)
    x2 = jax.random.normal(k6, (M2, F2), jnp.float32)

    out2 = border_energy(x2, a2, b2,
                         beta_a=beta_a, beta_b=beta_b, beta_border=beta_border,
                         normalize=True, mask_diagonale=True,
                         compute_dtype=jnp.float32, tile_m=64, tile_n=256)
    out2 = jax.block_until_ready(out2)
    ref2 = _reference(x2, a2, b2, beta_a=beta_a, beta_b=beta_b,
                      beta_border=beta_border)
    assert out2.shape == (M2,)
    assert jnp.allclose(out2, ref2, atol=1e-3, rtol=1e-3), (
        "max abs err", float(jnp.max(jnp.abs(out2 - ref2))))

    print("KERNEL_OK")
</pallas_src>

<mosaic_0001>
module attributes {stable_mosaic.version = 11 : i64} {
  func.func @_border_energy_kernel(%arg0: i32, %arg1: i32, %arg2: memref<8x32xf32, #tpu.memory_space<vmem>>, %arg3: memref<128x32xf32, #tpu.memory_space<vmem>>, %arg4: memref<128x32xf32, #tpu.memory_space<vmem>>, %arg5: memref<8x128xf32, #tpu.memory_space<vmem>>, %arg6: memref<8x32xf32, #tpu.memory_space<vmem>>, %arg7: memref<8x128xf32, #tpu.memory_space<vmem>>, %arg8: memref<8x128xf32, #tpu.memory_space<vmem>>, %arg9: memref<8x128xf32, #tpu.memory_space<vmem>>, %arg10: memref<8x128xf32, #tpu.memory_space<vmem>>) attributes {dimension_semantics = [#tpu.dimension_semantics<parallel>, #tpu.dimension_semantics<arbitrary>], iteration_bounds = array<i64: 1, 1>, scalar_prefetch = 0 : i64, scratch_operands = 5 : i64, tpu.core_type = #tpu.core_type<tc>, window_params = [{transform_indices = @transform_0, window_bounds = array<i64: 8, 32>}, {transform_indices = @transform_1, window_bounds = array<i64: 128, 32>}, {transform_indices = @transform_2, window_bounds = array<i64: 128, 32>}, {transform_indices = @transform_3, window_bounds = array<i64: 8, 128>}]} {
    %c8_i32 = arith.constant 8 : i32
    %0 = arith.muli %arg0, %c8_i32 : i32
    %c128_i32 = arith.constant 128 : i32
    %1 = arith.muli %arg1, %c128_i32 : i32
    %c0_i32 = arith.constant 0 : i32
    %2 = arith.cmpi eq, %arg1, %c0_i32 : i32
    %3 = arith.extui %2 : i1 to i32
    %c0_i32_0 = arith.constant 0 : i32
    %4 = arith.cmpi ne, %3, %c0_i32_0 : i32
    scf.if %4 {
      %c0_23 = arith.constant 0 : index
      %c0_24 = arith.constant 0 : index
      %43 = vector.load %arg2[%c0_23, %c0_24] : memref<8x32xf32, #tpu.memory_space<vmem>>, vector<8x32xf32>
      %44 = arith.mulf %43, %43 : vector<8x32xf32>
      %cst_25 = arith.constant dense<0.000000e+00> : vector<8xf32>
      %45 = vector.multi_reduction <add>, %44, %cst_25 [1] : vector<8x32xf32> to vector<8xf32>
      %46 = vector.shape_cast %45 : vector<8xf32> to vector<8x1xf32>
      %cst_26 = arith.constant 1.000000e-24 : f32
      %47 = vector.broadcast %cst_26 : f32 to vector<8x1xf32>
      %48 = arith.maximumf %46, %47 : vector<8x1xf32>
      %49 = math.rsqrt %48 : vector<8x1xf32>
      %50 = vector.broadcast %49 : vector<8x1xf32> to vector<8x32xf32>
      %51 = arith.mulf %43, %50 : vector<8x32xf32>
      %c0_27 = arith.constant 0 : index
      %c0_28 = arith.constant 0 : index
      %52 = vector.load %arg6[%c0_27, %c0_28] : memref<8x32xf32, #tpu.memory_space<vmem>>, vector<8x32xf32>
      tpu.vector_store %arg6[%c0_27, %c0_28], %51 {strides = array<i32>} : memref<8x32xf32, #tpu.memory_space<vmem>>, vector<8x32xf32>,
      %cst_29 = arith.constant 0xFF800000 : f32
      %53 = vector.broadcast %cst_29 : f32 to vector<8x128xf32>
      %c0_30 = arith.constant 0 : index
      %c0_31 = arith.constant 0 : index
      %54 = vector.load %arg7[%c0_30, %c0_31] : memref<8x128xf32, #tpu.memory_space<vmem>>, vector<8x128xf32>
      tpu.vector_store %arg7[%c0_30, %c0_31], %53 {strides = array<i32>} : memref<8x128xf32, #tpu.memory_space<vmem>>, vector<8x128xf32>,
      %cst_32 = arith.constant 0xFF800000 : f32
      %55 = vector.broadcast %cst_32 : f32 to vector<8x128xf32>
      %c0_33 = arith.constant 0 : index
      %c0_34 = arith.constant 0 : index
      %56 = vector.load %arg9[%c0_33, %c0_34] : memref<8x128xf32, #tpu.memory_space<vmem>>, vector<8x128xf32>
      tpu.vector_store %arg9[%c0_33, %c0_34], %55 {strides = array<i32>} : memref<8x128xf32, #tpu.memory_space<vmem>>, vector<8x128xf32>,
      %cst_35 = arith.constant 0.000000e+00 : f32
      %57 = vector.broadcast %cst_35 : f32 to vector<8x128xf32>
      %c0_36 = arith.constant 0 : index
      %c0_37 = arith.constant 0 : index
      %58 = vector.load %arg8[%c0_36, %c0_37] : memref<8x128xf32, #tpu.memory_space<vmem>>, vector<8x128xf32>
      tpu.vector_store %arg8[%c0_36, %c0_37], %57 {strides = array<i32>} : memref<8x128xf32, #tpu.memory_space<vmem>>, vector<8x128xf32>,
      %cst_38 = arith.constant 0.000000e+00 : f32
      %59 = vector.broadcast %cst_38 : f32 to vector<8x128xf32>
      %c0_39 = arith.constant 0 : index
      %c0_40 = arith.constant 0 : index
      %60 = vector.load %arg10[%c0_39, %c0_40] : memref<8x128xf32, #tpu.memory_space<vmem>>, vector<8x128xf32>
      tpu.vector_store %arg10[%c0_39, %c0_40], %59 {strides = array<i32>} : memref<8x128xf32, #tpu.memory_space<vmem>>, vector<8x128xf32>,
    } else {
    }
    %c0 = arith.constant 0 : index
    %c0_1 = arith.constant 0 : index
    %5 = vector.load %arg6[%c0, %c0_1] : memref<8x32xf32, #tpu.memory_space<vmem>>, vector<8x32xf32>
    %c0_2 = arith.constant 0 : index
    %c0_3 = arith.constant 0 : index
    %6 = vector.load %arg3[%c0_2, %c0_3] : memref<128x32xf32, #tpu.memory_space<vmem>>, vector<128x32xf32>
    %cst = arith.constant dense<0.000000e+00> : vector<8x128xf32>
    %7 = tpu.matmul %5, %6, %cst {dimension_numbers = #tpu.dot_dimension_numbers<[1], [1], [0], [0], [0, 0, 1, 0], [], []>} : vector<8x32xf32>, vector<128x32xf32>, vector<8x128xf32> -> vector<8x128xf32>
    %cst_4 = arith.constant 1.000000e+00 : f32
    %8 = vector.broadcast %cst_4 : f32 to vector<8x128xf32>
    %9 = arith.mulf %7, %8 : vector<8x128xf32>
    %c0_i32_5 = arith.constant 0 : i32
    %10 = arith.cmpi eq, %arg1, %c0_i32_5 : i32
    %c0_i32_6 = arith.constant 0 : i32
    %11 = arith.addi %c0_i32_6, %1 : i32
    %c8_i32_7 = arith.constant 8 : i32
    %12 = arith.addi %0, %c8_i32_7 : i32
    %13 = arith.cmpi slt, %11, %12 : i32
    %c128_i32_8 = arith.constant 128 : i32
    %14 = arith.addi %11, %c128_i32_8 : i32
    %15 = arith.cmpi slt, %0, %14 : i32
    %16 = arith.andi %13, %15 : i1
    %17 = arith.ori %10, %16 : i1
    %18 = arith.extui %17 : i1 to i32
    %c0_i32_9 = arith.constant 0 : i32
    %19 = arith.cmpi ne, %18, %c0_i32_9 : i32
    scf.if %19 {
      %43 = tpu.iota {dimensions = array<i32: 1>} : vector<8x128xi32>
      %44 = vector.broadcast %1 : i32 to vector<8x128xi32>
      %45 = arith.addi %44, %43 : vector<8x128xi32>
      %c4_i32_23 = arith.constant 4 : i32
      %46 = vector.broadcast %c4_i32_23 : i32 to vector<8x128xi32>
      %47 = arith.cmpi sge, %45, %46 : vector<8x128xi32>
      %48 = tpu.iota {dimensions = array<i32: 0>} : vector<8x128xi32>
      %49 = vector.broadcast %0 : i32 to vector<8x128xi32>
      %50 = arith.addi %49, %48 : vector<8x128xi32>
      %c0_i32_24 = arith.constant 0 : i32
      %51 = vector.broadcast %c0_i32_24 : i32 to vector<8x128xi32>
      %52 = arith.addi %51, %45 : vector<8x128xi32>
      %53 = arith.cmpi eq, %50, %52 : vector<8x128xi32>
      %54 = arith.ori %47, %53 : vector<8x128xi1>
      %cst_25 = arith.constant 0xFF800000 : f32
      %55 = vector.broadcast %cst_25 : f32 to vector<8x128xf32>
      %56 = arith.select %54, %55, %9 : vector<8x128xi1>, vector<8x128xf32>
      %c0_26 = arith.constant 0 : index
      %c0_27 = arith.constant 0 : index
      %57 = vector.load %arg7[%c0_26, %c0_27] : memref<8x128xf32, #tpu.memory_space<vmem>>, vector<8x128xf32>
      %58 = arith.maximumf %57, %56 : vector<8x128xf32>
      %cst_28 = arith.constant 0xFF800000 : f32
      %59 = vector.broadcast %cst_28 : f32 to vector<8x128xf32>
      %60 = arith.cmpf oeq, %58, %59 : vector<8x128xf32>
      %cst_29 = arith.constant 0.000000e+00 : f32
      %61 = vector.broadcast %cst_29 : f32 to vector<8x128xf32>
      %62 = arith.select %60, %61, %58 : vector<8x128xi1>, vector<8x128xf32>
      %63 = arith.subf %56, %62 : vector<8x128xf32>
      %64 = math.exp %63 : vector<8x128xf32>
      %65 = arith.subf %57, %62 : vector<8x128xf32>
      %66 = math.exp %65 : vector<8x128xf32>
      %c0_30 = arith.constant 0 : index
      %c0_31 = arith.constant 0 : index
      %67 = vector.load %arg8[%c0_30, %c0_31] : memref<8x128xf32, #tpu.memory_space<vmem>>, vector<8x128xf32>
      %68 = arith.mulf %66, %67 : vector<8x128xf32>
      %69 = arith.addf %68, %64 : vector<8x128xf32>
      %c0_32 = arith.constant 0 : index
      %c0_33 = arith.constant 0 : index
      %70 = vector.load %arg8[%c0_32, %c0_33] : memref<8x128xf32, #tpu.memory_space<vmem>>, vector<8x128xf32>
      tpu.vector_store %arg8[%c0_32, %c0_33], %69 {strides = array<i32>} : memref<8x128xf32, #tpu.memory_space<vmem>>, vector<8x128xf32>,
      %c0_34 = arith.constant 0 : index
      %c0_35 = arith.constant 0 : index
      %71 = vector.load %arg7[%c0_34, %c0_35] : memref<8x128xf32, #tpu.memory_space<vmem>>, vector<8x128xf32>
      tpu.vector_store %arg7[%c0_34, %c0_35], %58 {strides = array<i32>} : memref<8x128xf32, #tpu.memory_space<vmem>>, vector<8x128xf32>,
    } else {
    }
    %true = arith.constant true
    %20 = arith.xori %17, %true : i1
    %21 = arith.extui %20 : i1 to i32
    %c0_i32_10 = arith.constant 0 : i32
    %22 = arith.cmpi ne, %21, %c0_i32_10 : i32
    scf.if %22 {
      %c0_23 = arith.constant 0 : index
      %c0_24 = arith.constant 0 : index
      %43 = vector.load %arg7[%c0_23, %c0_24] : memref<8x128xf32, #tpu.memory_space<vmem>>, vector<8x128xf32>
      %44 = arith.maximumf %43, %9 : vector<8x128xf32>
      %cst_25 = arith.constant 0xFF800000 : f32
      %45 = vector.broadcast %cst_25 : f32 to vector<8x128xf32>
      %46 = arith.cmpf oeq, %44, %45 : vector<8x128xf32>
      %cst_26 = arith.constant 0.000000e+00 : f32
      %47 = vector.broadcast %cst_26 : f32 to vector<8x128xf32>
      %48 = arith.select %46, %47, %44 : vector<8x128xi1>, vector<8x128xf32>
      %49 = arith.subf %9, %48 : vector<8x128xf32>
      %50 = math.exp %49 : vector<8x128xf32>
      %51 = arith.subf %43, %48 : vector<8x128xf32>
      %52 = math.exp %51 : vector<8x128xf32>
      %c0_27 = arith.constant 0 : index
      %c0_28 = arith.constant 0 : index
      %53 = vector.load %arg8[%c0_27, %c0_28] : memref<8x128xf32, #tpu.memory_space<vmem>>, vector<8x128xf32>
      %54 = arith.mulf %52, %53 : vector<8x128xf32>
      %55 = arith.addf %54, %50 : vector<8x128xf32>
      %c0_29 = arith.constant 0 : index
      %c0_30 = arith.constant 0 : index
      %56 = vector.load %arg8[%c0_29, %c0_30] : memref<8x128xf32, #tpu.memory_space<vmem>>, vector<8x128xf32>
      tpu.vector_store %arg8[%c0_29, %c0_30], %55 {strides = array<i32>} : memref<8x128xf32, #tpu.memory_space<vmem>>, vector<8x128xf32>,
      %c0_31 = arith.constant 0 : index
      %c0_32 = arith.constant 0 : index
      %57 = vector.load %arg7[%c0_31, %c0_32] : memref<8x128xf32, #tpu.memory_space<vmem>>, vector<8x128xf32>
      tpu.vector_store %arg7[%c0_31, %c0_32], %44 {strides = array<i32>} : memref<8x128xf32, #tpu.memory_space<vmem>>, vector<8x128xf32>,
    } else {
    }
    %c0_11 = arith.constant 0 : index
    %c0_12 = arith.constant 0 : index
    %23 = vector.load %arg4[%c0_11, %c0_12] : memref<128x32xf32, #tpu.memory_space<vmem>>, vector<128x32xf32>
    %cst_13 = arith.constant dense<0.000000e+00> : vector<8x128xf32>
    %24 = tpu.matmul %5, %23, %cst_13 {dimension_numbers = #tpu.dot_dimension_numbers<[1], [1], [0], [0], [0, 0, 1, 0], [], []>} : vector<8x32xf32>, vector<128x32xf32>, vector<8x128xf32> -> vector<8x128xf32>
    %cst_14 = arith.constant 1.500000e+00 : f32
    %25 = vector.broadcast %cst_14 : f32 to vector<8x128xf32>
    %26 = arith.mulf %24, %25 : vector<8x128xf32>
    %c0_i32_15 = arith.constant 0 : i32
    %27 = arith.cmpi eq, %arg1, %c0_i32_15 : i32
    %c4_i32 = arith.constant 4 : i32
    %28 = arith.addi %c4_i32, %1 : i32
    %c8_i32_16 = arith.constant 8 : i32
    %29 = arith.addi %0, %c8_i32_16 : i32
    %30 = arith.cmpi slt, %28, %29 : i32
    %c128_i32_17 = arith.constant 128 : i32
    %31 = arith.addi %28, %c128_i32_17 : i32
    %32 = arith.cmpi slt, %0, %31 : i32
    %33 = arith.andi %30, %32 : i1
    %34 = arith.ori %27, %33 : i1
    %35 = arith.extui %34 : i1 to i32
    %c0_i32_18 = arith.constant 0 : i32
    %36 = arith.cmpi ne, %35, %c0_i32_18 : i32
    scf.if %36 {
      %43 = tpu.iota {dimensions = array<i32: 1>} : vector<8x128xi32>
      %44 = vector.broadcast %1 : i32 to vector<8x128xi32>
      %45 = arith.addi %44, %43 : vector<8x128xi32>
      %c4_i32_23 = arith.constant 4 : i32
      %46 = vector.broadcast %c4_i32_23 : i32 to vector<8x128xi32>
      %47 = arith.cmpi sge, %45, %46 : vector<8x128xi32>
      %48 = tpu.iota {dimensions = array<i32: 0>} : vector<8x128xi32>
      %49 = vector.broadcast %0 : i32 to vector<8x128xi32>
      %50 = arith.addi %49, %48 : vector<8x128xi32>
      %c4_i32_24 = arith.constant 4 : i32
      %51 = vector.broadcast %c4_i32_24 : i32 to vector<8x128xi32>
      %52 = arith.addi %51, %45 : vector<8x128xi32>
      %53 = arith.cmpi eq, %50, %52 : vector<8x128xi32>
      %54 = arith.ori %47, %53 : vector<8x128xi1>
      %cst_25 = arith.constant 0xFF800000 : f32
      %55 = vector.broadcast %cst_25 : f32 to vector<8x128xf32>
      %56 = arith.select %54, %55, %26 : vector<8x128xi1>, vector<8x128xf32>
      %c0_26 = arith.constant 0 : index
      %c0_27 = arith.constant 0 : index
      %57 = vector.load %arg9[%c0_26, %c0_27] : memref<8x128xf32, #tpu.memory_space<vmem>>, vector<8x128xf32>
      %58 = arith.maximumf %57, %56 : vector<8x128xf32>
      %cst_28 = arith.constant 0xFF800000 : f32
      %59 = vector.broadcast %cst_28 : f32 to vector<8x128xf32>
      %60 = arith.cmpf oeq, %58, %59 : vector<8x128xf32>
      %cst_29 = arith.constant 0.000000e+00 : f32
      %61 = vector.broadcast %cst_29 : f32 to vector<8x128xf32>
      %62 = arith.select %60, %61, %58 : vector<8x128xi1>, vector<8x128xf32>
      %63 = arith.subf %56, %62 : vector<8x128xf32>
      %64 = math.exp %63 : vector<8x128xf32>
      %65 = arith.subf %57, %62 : vector<8x128xf32>
      %66 = math.exp %65 : vector<8x128xf32>
      %c0_30 = arith.constant 0 : index
      %c0_31 = arith.constant 0 : index
      %67 = vector.load %arg10[%c0_30, %c0_31] : memref<8x128xf32, #tpu.memory_space<vmem>>, vector<8x128xf32>
      %68 = arith.mulf %66, %67 : vector<8x128xf32>
      %69 = arith.addf %68, %64 : vector<8x128xf32>
      %c0_32 = arith.constant 0 : index
      %c0_33 = arith.constant 0 : index
      %70 = vector.load %arg10[%c0_32, %c0_33] : memref<8x128xf32, #tpu.memory_space<vmem>>, vector<8x128xf32>
      tpu.vector_store %arg10[%c0_32, %c0_33], %69 {strides = array<i32>} : memref<8x128xf32, #tpu.memory_space<vmem>>, vector<8x128xf32>,
      %c0_34 = arith.constant 0 : index
      %c0_35 = arith.constant 0 : index
      %71 = vector.load %arg9[%c0_34, %c0_35] : memref<8x128xf32, #tpu.memory_space<vmem>>, vector<8x128xf32>
      tpu.vector_store %arg9[%c0_34, %c0_35], %58 {strides = array<i32>} : memref<8x128xf32, #tpu.memory_space<vmem>>, vector<8x128xf32>,
    } else {
    }
    %true_19 = arith.constant true
    %37 = arith.xori %34, %true_19 : i1
    %38 = arith.extui %37 : i1 to i32
    %c0_i32_20 = arith.constant 0 : i32
    %39 = arith.cmpi ne, %38, %c0_i32_20 : i32
    scf.if %39 {
      %c0_23 = arith.constant 0 : index
      %c0_24 = arith.constant 0 : index
      %43 = vector.load %arg9[%c0_23, %c0_24] : memref<8x128xf32, #tpu.memory_space<vmem>>, vector<8x128xf32>
      %44 = arith.maximumf %43, %26 : vector<8x128xf32>
      %cst_25 = arith.constant 0xFF800000 : f32
      %45 = vector.broadcast %cst_25 : f32 to vector<8x128xf32>
      %46 = arith.cmpf oeq, %44, %45 : vector<8x128xf32>
      %cst_26 = arith.constant 0.000000e+00 : f32
      %47 = vector.broadcast %cst_26 : f32 to vector<8x128xf32>
      %48 = arith.select %46, %47, %44 : vector<8x128xi1>, vector<8x128xf32>
      %49 = arith.subf %26, %48 : vector<8x128xf32>
      %50 = math.exp %49 : vector<8x128xf32>
      %51 = arith.subf %43, %48 : vector<8x128xf32>
      %52 = math.exp %51 : vector<8x128xf32>
      %c0_27 = arith.constant 0 : index
      %c0_28 = arith.constant 0 : index
      %53 = vector.load %arg10[%c0_27, %c0_28] : memref<8x128xf32, #tpu.memory_space<vmem>>, vector<8x128xf32>
      %54 = arith.mulf %52, %53 : vector<8x128xf32>
      %55 = arith.addf %54, %50 : vector<8x128xf32>
      %c0_29 = arith.constant 0 : index
      %c0_30 = arith.constant 0 : index
      %56 = vector.load %arg10[%c0_29, %c0_30] : memref<8x128xf32, #tpu.memory_space<vmem>>, vector<8x128xf32>
      tpu.vector_store %arg10[%c0_29, %c0_30], %55 {strides = array<i32>} : memref<8x128xf32, #tpu.memory_space<vmem>>, vector<8x128xf32>,
      %c0_31 = arith.constant 0 : index
      %c0_32 = arith.constant 0 : index
      %57 = vector.load %arg9[%c0_31, %c0_32] : memref<8x128xf32, #tpu.memory_space<vmem>>, vector<8x128xf32>
      tpu.vector_store %arg9[%c0_31, %c0_32], %44 {strides = array<i32>} : memref<8x128xf32, #tpu.memory_space<vmem>>, vector<8x128xf32>,
    } else {
    }
    %c0_i32_21 = arith.constant 0 : i32
    %40 = arith.cmpi eq, %arg1, %c0_i32_21 : i32
    %41 = arith.extui %40 : i1 to i32
    %c0_i32_22 = arith.constant 0 : i32
    %42 = arith.cmpi ne, %41, %c0_i32_22 : i32
    scf.if %42 {
      %c0_23 = arith.constant 0 : index
      %c0_24 = arith.constant 0 : index
      %43 = vector.load %arg7[%c0_23, %c0_24] : memref<8x128xf32, #tpu.memory_space<vmem>>, vector<8x128xf32>
      %c0_25 = arith.constant 0 : index
      %c0_26 = arith.constant 0 : index
      %44 = vector.load %arg8[%c0_25, %c0_26] : memref<8x128xf32, #tpu.memory_space<vmem>>, vector<8x128xf32>
      %cst_27 = arith.constant dense<0xFF800000> : vector<8xf32>
      %45 = vector.multi_reduction <maximumf>, %43, %cst_27 [1] : vector<8x128xf32> to vector<8xf32>
      %46 = vector.shape_cast %45 : vector<8xf32> to vector<8x1xf32>
      %cst_28 = arith.constant 0xFF800000 : f32
      %47 = vector.broadcast %cst_28 : f32 to vector<8x1xf32>
      %48 = arith.cmpf oeq, %46, %47 : vector<8x1xf32>
      %cst_29 = arith.constant 0.000000e+00 : f32
      %49 = vector.broadcast %cst_29 : f32 to vector<8x1xf32>
      %50 = arith.select %48, %49, %46 : vector<8x1xi1>, vector<8x1xf32>
      %51 = vector.broadcast %50 : vector<8x1xf32> to vector<8x128xf32>
      %52 = arith.subf %43, %51 : vector<8x128xf32>
      %53 = math.exp %52 : vector<8x128xf32>
      %54 = arith.mulf %44, %53 : vector<8x128xf32>
      %cst_30 = arith.constant dense<0.000000e+00> : vector<8xf32>
      %55 = vector.multi_reduction <add>, %54, %cst_30 [1] : vector<8x128xf32> to vector<8xf32>
      %56 = vector.shape_cast %55 : vector<8xf32> to vector<8x1xf32>
      %cst_31 = arith.constant 0.000000e+00 : f32
      %57 = vector.broadcast %cst_31 : f32 to vector<8x1xf32>
      %58 = arith.cmpf ogt, %56, %57 : vector<8x1xf32>
      %cst_32 = arith.constant 1.401300e-45 : f32
      %59 = vector.broadcast %cst_32 : f32 to vector<8x1xf32>
      %60 = arith.maximumf %56, %59 : vector<8x1xf32>
      %61 = math.log %60 : vector<8x1xf32>
      %62 = arith.addf %50, %61 : vector<8x1xf32>
      %cst_33 = arith.constant 0xFF800000 : f32
      %63 = vector.broadcast %cst_33 : f32 to vector<8x1xf32>
      %64 = arith.select %58, %62, %63 : vector<8x1xi1>, vector<8x1xf32>
      %c0_34 = arith.constant 0 : index
      %c0_35 = arith.constant 0 : index
      %65 = vector.load %arg9[%c0_34, %c0_35] : memref<8x128xf32, #tpu.memory_space<vmem>>, vector<8x128xf32>
      %c0_36 = arith.constant 0 : index
      %c0_37 = arith.constant 0 : index
      %66 = vector.load %arg10[%c0_36, %c0_37] : memref<8x128xf32, #tpu.memory_space<vmem>>, vector<8x128xf32>
      %cst_38 = arith.constant dense<0xFF800000> : vector<8xf32>
      %67 = vector.multi_reduction <maximumf>, %65, %cst_38 [1] : vector<8x128xf32> to vector<8xf32>
      %68 = vector.shape_cast %67 : vector<8xf32> to vector<8x1xf32>
      %cst_39 = arith.constant 0xFF800000 : f32
      %69 = vector.broadcast %cst_39 : f32 to vector<8x1xf32>
      %70 = arith.cmpf oeq, %68, %69 : vector<8x1xf32>
      %cst_40 = arith.constant 0.000000e+00 : f32
      %71 = vector.broadcast %cst_40 : f32 to vector<8x1xf32>
      %72 = arith.select %70, %71, %68 : vector<8x1xi1>, vector<8x1xf32>
      %73 = vector.broadcast %72 : vector<8x1xf32> to vector<8x128xf32>
      %74 = arith.subf %65, %73 : vector<8x128xf32>
      %75 = math.exp %74 : vector<8x128xf32>
      %76 = arith.mulf %66, %75 : vector<8x128xf32>
      %cst_41 = arith.constant dense<0.000000e+00> : vector<8xf32>
      %77 = vector.multi_reduction <add>, %76, %cst_41 [1] : vector<8x128xf32> to vector<8xf32>
      %78 = vector.shape_cast %77 : vector<8xf32> to vector<8x1xf32>
      %cst_42 = arith.constant 0.000000e+00 : f32
      %79 = vector.broadcast %cst_42 : f32 to vector<8x1xf32>
      %80 = arith.cmpf ogt, %78, %79 : vector<8x1xf32>
      %cst_43 = arith.constant 1.401300e-45 : f32
      %81 = vector.broadcast %cst_43 : f32 to vector<8x1xf32>
      %82 = arith.maximumf %78, %81 : vector<8x1xf32>
      %83 = math.log %82 : vector<8x1xf32>
      %84 = arith.addf %72, %83 : vector<8x1xf32>
      %cst_44 = arith.constant 0xFF800000 : f32
      %85 = vector.broadcast %cst_44 : f32 to vector<8x1xf32>
      %86 = arith.select %80, %84, %85 : vector<8x1xi1>, vector<8x1xf32>
      %cst_45 = arith.constant 1.38629436 : f32
      %87 = vector.broadcast %cst_45 : f32 to vector<8x1xf32>
      %88 = arith.subf %87, %64 : vector<8x1xf32>
      %cst_46 = arith.constant 1.000000e+00 : f32
      %89 = vector.broadcast %cst_46 : f32 to vector<8x1xf32>
      %90 = arith.mulf %88, %89 : vector<8x1xf32>
      %cst_47 = arith.constant 1.38629436 : f32
      %91 = vector.broadcast %cst_47 : f32 to vector<8x1xf32>
      %92 = arith.subf %91, %86 : vector<8x1xf32>
      %cst_48 = arith.constant 0.666666686 : f32
      %93 = vector.broadcast %cst_48 : f32 to vector<8x1xf32>
      %94 = arith.mulf %92, %93 : vector<8x1xf32>
      %cst_49 = arith.constant -2.000000e+00 : f32
      %95 = vector.broadcast %cst_49 : f32 to vector<8x1xf32>
      %96 = arith.mulf %95, %90 : vector<8x1xf32>
      %cst_50 = arith.constant -2.000000e+00 : f32
      %97 = vector.broadcast %cst_50 : f32 to vector<8x1xf32>
      %98 = arith.mulf %97, %94 : vector<8x1xf32>
      %99 = arith.maximumf %96, %98 : vector<8x1xf32>
      %cst_51 = arith.constant 0xFF800000 : f32
      %100 = vector.broadcast %cst_51 : f32 to vector<8x1xf32>
      %101 = arith.cmpf oeq, %99, %100 : vector<8x1xf32>
      %cst_52 = arith.constant 0.000000e+00 : f32
      %102 = vector.broadcast %cst_52 : f32 to vector<8x1xf32>
      %103 = arith.select %101, %102, %99 : vector<8x1xi1>, vector<8x1xf32>
      %104 = arith.subf %96, %103 : vector<8x1xf32>
      %105 = math.exp %104 : vector<8x1xf32>
      %106 = arith.subf %98, %103 : vector<8x1xf32>
      %107 = math.exp %106 : vector<8x1xf32>
      %108 = arith.addf %105, %107 : vector<8x1xf32>
      %109 = math.log %108 : vector<8x1xf32>
      %110 = arith.addf %99, %109 : vector<8x1xf32>
      %cst_53 = arith.constant 0.693147182 : f32
      %111 = vector.broadcast %cst_53 : f32 to vector<8x1xf32>
      %112 = arith.subf %111, %110 : vector<8x1xf32>
      %cst_54 = arith.constant 5.000000e-01 : f32
      %113 = vector.broadcast %cst_54 : f32 to vector<8x1xf32>
      %114 = arith.mulf %112, %113 : vector<8x1xf32>
      %115 = arith.addf %90, %94 : vector<8x1xf32>
      %cst_55 = arith.constant 2.000000e+00 : f32
      %116 = vector.broadcast %cst_55 : f32 to vector<8x1xf32>
      %117 = arith.mulf %116, %114 : vector<8x1xf32>
      %118 = arith.subf %115, %117 : vector<8x1xf32>
      %119 = vector.shape_cast %118 : vector<8x1xf32> to vector<8x1xf32>
      %120 = vector.broadcast %119 : vector<8x1xf32> to vector<8x128xf32>
      %c0_56 = arith.constant 0 : index
      %c0_57 = arith.constant 0 : index
      %121 = vector.load %arg5[%c0_56, %c0_57] : memref<8x128xf32, #tpu.memory_space<vmem>>, vector<8x128xf32>
      tpu.vector_store %arg5[%c0_56, %c0_57], %120 {strides = array<i32>} : memref<8x128xf32, #tpu.memory_space<vmem>>, vector<8x128xf32>,
    } else {
    }
    return
  }
  func.func @transform_0(%arg0: i32, %arg1: i32) -> (i32, i32) {
    %c0_i32 = arith.constant 0 : i32
    %c0_i32_0 = arith.constant 0 : i32
    return %arg0, %c0_i32 : i32, i32
  }
  func.func @transform_1(%arg0: i32, %arg1: i32) -> (i32, i32) {
    %c0_i32 = arith.constant 0 : i32
    %c0_i32_0 = arith.constant 0 : i32
    return %arg1, %c0_i32 : i32, i32
  }
  func.func @transform_2(%arg0: i32, %arg1: i32) -> (i32, i32) {
    %c0_i32 = arith.constant 0 : i32
    %c0_i32_0 = arith.constant 0 : i32
    return %arg1, %c0_i32 : i32, i32
  }
  func.func @transform_3(%arg0: i32, %arg1: i32) -> (i32, i32) {
    %c0_i32 = arith.constant 0 : i32
    %c0_i32_0 = arith.constant 0 : i32
    return %arg0, %c0_i32 : i32, i32
  }
}

</mosaic_0001>

<bundles_post_ra>
// kernel: tpu_custom_call.1
= control target key start
LH: loop header
LB: loop body
LE: loop exit
PB: predicated region body
PF: predicated region fallthrough
CT: control target
= control target key end

     0   :  { %vm23_vm0 = vcmask 261120   ;;  %v751_v5 = vmov 0.0|0.0   ;;  %s949_s0 = inlined_call_operand.vmem [shape: f32[8,32], index: 0, kind: input, shape index: {}]   ;;  %s950_s1 = inlined_call_operand.vmem [shape: f32[128,32], index: 1, kind: input, shape index: {}]   ;;  %s951_s2 = inlined_call_operand.vmem [shape: f32[128,32], index: 2, kind: input, shape index: {}]   ;;  %s952_s3 = inlined_call_operand.hbm [shape: f32[8,128], index: 3, kind: output, shape index: {}]  }
   0x1   :  { %v778_v0 = vld [vmem:[%s949_s0] sm:$0xff]  ;;  %v37_v2 = vld [vmem:[%s950_s1 + $0x8] sm:$0xff]  ;;  %vm790_vm1 = vmpackc.low %vm23_vm0, %vm23_vm0  ;;  %635 = vmatprep.subr.bf16.mxu0 %v751_v5  ;;  %667 = vmatprep.subr.bf16.mxu1 %v751_v5 }
   0x2   :  { %v36_v1 = vld [vmem:[%s950_s1] sm:$0xff]  ;;  %v22_v3 = vmul.f32 %v778_v0, %v778_v0  ;;  %v230_v8 = vld [vmem:[%s951_s2 + $0x8] sm:$0xff]  ;;  %v38_v11 = vld [vmem:[%s950_s1 + $0x10] sm:$0xff] }
   0x3   :  { %v636_v6 = vpack.c.bf16 %v37_v2, %v36_v1  ;;  %v229_v7 = vld [vmem:[%s951_s2] sm:$0xff]  ;;  %v39_v12 = vld [vmem:[%s950_s1 + $0x18] sm:$0xff]  ;;  %v231_v13 = vld [vmem:[%s951_s2 + $0x10] sm:$0xff] }
   0x4   :  { %v668_v9 = vpack.c.bf16 %v230_v8, %v229_v7  ;;  %v24_v10 = vsel %vm23_vm0, %v22_v3, 0.0  ;;  %v232_v14 = vld [vmem:[%s951_s2 + $0x18] sm:$0xff]  ;;  %v640_v15 = vpack.c.bf16 %v39_v12, %v38_v11 }
   0x5   :  { %638 = vmatpush3.bf16.xpose.msk.msra.mxu0 %vm790_vm1, %v636_v6  ;;  %25 = vadd.xlane.f32.xlu0 %v24_v10 }
   0x6   :  { %670 = vmatpush3.bf16.xpose.msk.msra.mxu1 %vm790_vm1, %v668_v9  ;;  %639 = vmatprep.subr.bf16.mxu0 %v751_v5 }
   0x7   :  { %671 = vmatprep.subr.bf16.mxu1 %v751_v5 }
   0x8   :  { %8 = vsyncpa [#allocation8], 0  ;;  %v672_v16 = vpack.c.bf16 %v232_v14, %v231_v13  ;;  %v40_v17 = vld [vmem:[%s950_s1 + $0x20] sm:$0xff]  ;;  %v41_v18 = vld [vmem:[%s950_s1 + $0x28] sm:$0xff]  ;;  %vm752_vm2 = vmmov 0   ;;  %v753_v35 = vmov 0.0   ;;  %v184_v59 = vlaneseq }
   0x9   :  { %v233_v19 = vld [vmem:[%s951_s2 + $0x20] sm:$0xff]  ;;  %v234_v20 = vld [vmem:[%s951_s2 + $0x28] sm:$0xff]  ;;  %v644_v21 = vpack.c.bf16 %v41_v18, %v40_v17  ;;  %v42_v23 = vld [vmem:[%s950_s1 + $0x30] sm:$0xff]  ;;  %597 = vmatprep.mubr.msk.f32.mxu0 %vm752_vm2, %v753_v35  ;;  %632 = vmatprep.mubr.msk.f32.mxu1 %vm752_vm2, %v753_v35 }
   0xa   :  { %v676_v22 = vpack.c.bf16 %v234_v20, %v233_v19  ;;  %v43_v24 = vld [vmem:[%s950_s1 + $0x38] sm:$0xff]  ;;  %v235_v25 = vld [vmem:[%s951_s2 + $0x30] sm:$0xff]  ;;  %v44_v29 = vld [vmem:[%s950_s1 + $0x40] sm:$0xff]  ;;  %v185_v60 = vand.u32 127, %v184_v59  ;;  %v190_v61 = vshrl.u32 %v184_v59, 7 }
   0xb   :  { %v236_v26 = vld [vmem:[%s951_s2 + $0x38] sm:$0xff]  ;;  %v648_v27 = vpack.c.bf16 %v43_v24, %v42_v23  ;;  %v45_v30 = vld [vmem:[%s950_s1 + $0x48] sm:$0xff]  ;;  %v237_v31 = vld [vmem:[%s951_s2 + $0x40] sm:$0xff] }
   0xc   :  { %v680_v28 = vpack.c.bf16 %v236_v26, %v235_v25  ;;  %v238_v32 = vld [vmem:[%s951_s2 + $0x48] sm:$0xff]  ;;  %v652_v33 = vpack.c.bf16 %v45_v30, %v44_v29  ;;  %v46_v36 = vld [vmem:[%s950_s1 + $0x50] sm:$0xff]  ;;  %v47_v37 = vld [vmem:[%s950_s1 + $0x58] sm:$0xff]  ;;  %v383_v62 = vadd.s32 4, %v185_v60  ;;  %vm188_vm3 = vcmp.ge.s32.totalorder %v185_v60, 4 }
   0xd   :  { %642 = vmatpush3.bf16.xpose.msk.msra.mxu0 %vm790_vm1, %v640_v15  ;;  %v684_v34 = vpack.c.bf16 %v238_v32, %v237_v31  ;;  %v239_v38 = vld [vmem:[%s951_s2 + $0x50] sm:$0xff]  ;;  %v240_v39 = vld [vmem:[%s951_s2 + $0x58] sm:$0xff]  ;;  %v656_v40 = vpack.c.bf16 %v47_v37, %v46_v36  ;;  %v48_v42 = vld [vmem:[%s950_s1 + $0x60] sm:$0xff]  ;;  %vm193_vm4 = vcmp.eq.s32.totalorder %v190_v61, %v185_v60 }
   0xe   :  { %674 = vmatpush3.bf16.xpose.msk.msra.mxu1 %vm790_vm1, %v672_v16  ;;  %643 = vmatprep.subr.bf16.mxu0 %v751_v5  ;;  %v688_v41 = vpack.c.bf16 %v240_v39, %v239_v38  ;;  %v49_v43 = vld [vmem:[%s950_s1 + $0x68] sm:$0xff]  ;;  %v241_v44 = vld [vmem:[%s951_s2 + $0x60] sm:$0xff]  ;;  %v50_v48 = vld [vmem:[%s950_s1 + $0x70] sm:$0xff]  ;;  %vm384_vm5 = vcmp.eq.s32.totalorder %v190_v61, %v383_v62 }
   0xf   :  { %675 = vmatprep.subr.bf16.mxu1 %v751_v5  ;;  %v242_v45 = vld [vmem:[%s951_s2 + $0x68] sm:$0xff]  ;;  %v660_v46 = vpack.c.bf16 %v49_v43, %v48_v42  ;;  %v51_v49 = vld [vmem:[%s950_s1 + $0x78] sm:$0xff]  ;;  %v243_v50 = vld [vmem:[%s951_s2 + $0x70] sm:$0xff]  ;;  %s754_s1 = smov [#allocation7]  }
  0x10   :  { %v692_v47 = vpack.c.bf16 %v242_v45, %v241_v44  ;;  %v244_v51 = vld [vmem:[%s951_s2 + $0x78] sm:$0xff]  ;;  %v664_v52 = vpack.c.bf16 %v51_v49, %v50_v48  ;;  %vm194_vm6 = vmor %vm188_vm3, %vm193_vm4  ;;  %s489_s2 = sshll.u32 %s754_s1, 4  ;;  %s490_s2 = int_to_ptr.vmem [resolvable:$true] %s489_s2 }
  0x11   :  { %v696_v53 = vpack.c.bf16 %v244_v51, %v243_v50  ;;  %vm385_vm7 = vmor %vm188_vm3, %vm384_vm5  ;;  %s727_s21 = scalar_lea.vmem %s490_s2, 128  ;;  %p732_p1 = scmp.lt.s32.totalorder %s490_s2, %s490_s2 }
  0x12   :  { %p728_p0 = scmp.ne.s32.totalorder %s490_s2, %s727_s21  ;;  %p733_p2 = scmp.lt.s32.totalorder %s727_s21, %s727_s21 }
  0x14   :  { %p734_p3 = por %p733_p2, %p732_p1 }
  0x15   :  { %646 = vmatpush3.bf16.xpose.msk.msra.mxu0 %vm790_vm1, %v644_v21 }
  0x16   :  { %678 = vmatpush3.bf16.xpose.msk.msra.mxu1 %vm790_vm1, %v676_v22  ;;  %647 = vmatprep.subr.bf16.mxu0 %v751_v5  ;;  %p735_p4 = pnand %p734_p3, %p728_p0 }
  0x17   :  { %679 = vmatprep.subr.bf16.mxu1 %v751_v5 }
  0x1d   :  { %650 = vmatpush3.bf16.xpose.msk.msra.mxu0 %vm790_vm1, %v648_v27 }
  0x1e   :  { %682 = vmatpush3.bf16.xpose.msk.msra.mxu1 %vm790_vm1, %v680_v28  ;;  %651 = vmatprep.subr.bf16.mxu0 %v751_v5 }
  0x1f   :  { %683 = vmatprep.subr.bf16.mxu1 %v751_v5 }
  0x25   :  { %654 = vmatpush3.bf16.xpose.msk.msra.mxu0 %vm790_vm1, %v652_v33 }
  0x26   :  { %686 = vmatpush3.bf16.xpose.msk.msra.mxu1 %vm790_vm1, %v684_v34  ;;  %655 = vmatprep.subr.bf16.mxu0 %v751_v5 }
  0x27   :  { %687 = vmatprep.subr.bf16.mxu1 %v751_v5 }
  0x2d   :  { %658 = vmatpush3.bf16.xpose.msk.msra.mxu0 %vm790_vm1, %v656_v40 }
  0x2e   :  { %690 = vmatpush3.bf16.xpose.msk.msra.mxu1 %vm790_vm1, %v688_v41  ;;  %659 = vmatprep.subr.bf16.mxu0 %v751_v5 }
  0x2f   :  { %691 = vmatprep.subr.bf16.mxu1 %v751_v5 }
  0x35   :  { %662 = vmatpush3.bf16.xpose.msk.msra.mxu0 %vm790_vm1, %v660_v46 }
  0x36   :  { %694 = vmatpush3.bf16.xpose.msk.msra.mxu1 %vm790_vm1, %v692_v47  ;;  %663 = vmatprep.subr.bf16.mxu0 %v751_v5 }
  0x37   :  { %695 = vmatprep.subr.bf16.mxu1 %v751_v5 }
  0x3d   :  { %666 = vmatpush3.bf16.xpose.msk.msra.mxu0 %vm790_vm1, %v664_v52 }
  0x3e   :  { %698 = vmatpush3.bf16.xpose.msk.msra.mxu1 %vm790_vm1, %v696_v53 }
  0x92   :  { %v26_v54 = vpop.xlane.xlu0 %25 }
  0x93   :  { %v27_v55 = vmax.f32 %v26_v54, 1e-24 }
  0x95   :  { %703 = vrsqrt.f32 %v27_v55 }
  0x9f   :  { %v704_v56 = vpop.eup %703 }
  0xa0   :  { %v29_v57 = vmul.f32 %v704_v56, %v778_v0 }
  0xa2   :  { %30 = vst.msk [vmem:[#allocation2] sm:$0xff] %vm23_vm0, %v29_v57 }
  0xa9   :  { %v35_v58 = vld [vmem:[#allocation2] sm:$0xff] }
  0xaa   :  { %598 = vmatmul.mubr.msk.f32.vlgmr.msra.gmra.mrb[0].mxu0 %vm23_vm0, %v35_v58  ;;  %633 = vmatmul.mubr.msk.f32.vlgmr.msra.gmra.mrb[0].mxu1 %vm23_vm0, %v35_v58 }
 0x17d   :  { %v170_v63 = vpop.f32.mrb[0].mxu0  ;;  %v359_v1 = vpop.f32.mrb[0].mxu1 }
 0x17e   :  { %v195_v2 = vsel %vm194_vm6, -inf, %v170_v63  ;;  %v363_v0 = vmul.f32 1.5, %v359_v1  ;;  %v599_v3 = vpop.f32.mrb[1].mxu0  ;;  %v634_v4 = vpop.f32.mrb[1].mxu1 }
 0x17f   :  { %425 = vmax.xlane.f32.xlu1 %v195_v2  ;;  %vm198_vm8 = vcmp.eq.f32.partialorder %v195_v2, -inf }
 0x180   :  { %v386_v5 = vsel %vm385_vm7, -inf, %v363_v0  ;;  %v199_v6 = vsel %vm198_vm8, 0.0, %v195_v2 }
 0x181   :  { %443 = vmax.xlane.f32.xlu0 %v386_v5  ;;  %vm389_vm9 = vcmp.eq.f32.partialorder %v386_v5, -inf  ;;  %v203_v8 = vsub.f32 -inf, %v199_v6  ;;  %v200_v11 = vsub.f32 %v195_v2, %v199_v6 }
 0x182   :  { %v390_v7 = vsel %vm389_vm9, 0.0, %v386_v5 }
 0x183   :  { %v394_v9 = vsub.f32 -inf, %v390_v7  ;;  %v204_v10 = vmul.f32 1.442695, %v203_v8  ;;  %v391_v13 = vsub.f32 %v386_v5, %v390_v7  ;;  %v201_v15 = vmul.f32 1.442695, %v200_v11 }
 0x185   :  { %v395_v12 = vmul.f32 1.442695, %v394_v9  ;;  %705 = vpow2.f32 %v204_v10  ;;  %v392_v16 = vmul.f32 1.442695, %v391_v13 }
 0x187   :  { %707 = vpow2.f32 %v395_v12 }
 0x188   :  { %709 = vpow2.f32 %v201_v15 }
 0x189   :  { %711 = vpow2.f32 %v392_v16 }
 0x18f   :  { %v706_v24 = vpop.eup %705 }
 0x190   :  { %v207_v26 = vmul.f32 0.0, %v706_v24 }
 0x191   :  { %v708_v25 = vpop.eup %707 }
 0x192   :  { %v398_v27 = vmul.f32 0.0, %v708_v25  ;;  %v710_v28 = vpop.eup %709 }
 0x193   :  { %v712_v29 = vpop.eup %711  ;;  %v208_v30 = vadd.f32 %v710_v28, %v207_v26 }
 0x194   :  { %v399_v33 = vadd.f32 %v712_v29, %v398_v27 }
 0x20c   :  { %v426_v14 = vpop.xlane.xlu1 %425 }
 0x20d   :  { %vm427_vm10 = vcmp.eq.f32.partialorder %v426_v14, -inf }
 0x20e   :  { %v428_v17 = vsel %vm427_vm10, 0.0, %v426_v14  ;;  %v444_v18 = vpop.xlane.xlu0 %443 }
 0x20f   :  { %v429_v19 = vsub.f32 %v195_v2, %v428_v17  ;;  %vm445_vm11 = vcmp.eq.f32.partialorder %v444_v18, -inf }
 0x210   :  { %v446_v20 = vsel %vm445_vm11, 0.0, %v444_v18 }
 0x211   :  { %v430_v21 = vmul.f32 1.442695, %v429_v19  ;;  %v447_v22 = vsub.f32 %v386_v5, %v446_v20 }
 0x213   :  { %713 = vpow2.f32 %v430_v21  ;;  %v448_v23 = vmul.f32 1.442695, %v447_v22 }
 0x215   :  { %715 = vpow2.f32 %v448_v23 }
 0x21d   :  { %v714_v31 = vpop.eup %713 }
 0x21e   :  { %v432_v32 = vmul.f32 %v714_v31, %v208_v30 }
 0x21f   :  { %v716_v34 = vpop.eup %715 }
 0x220   :  { %433 = vadd.xlane.f32.xlu0 %v432_v32  ;;  %v450_v35 = vmul.f32 %v716_v34, %v399_v33 }
 0x222   :  { %451 = vadd.xlane.f32.xlu1 %v450_v35 }
 0x2ad   :  { %v434_v36 = vpop.xlane.xlu0 %433 }
 0x2ae   :  { %v436_v37 = vmax.f32 %v434_v36, 1e-45  ;;  %vm435_vm12 = vcmp.gt.f32.partialorder %v434_v36, 0.0 }
 0x2af   :  { %v452_v38 = vpop.xlane.xlu1 %451 }
 0x2b0   :  { %717 = vlog2.f32 %v436_v37  ;;  %v454_v39 = vmax.f32 %v452_v38, 1e-45  ;;  %vm453_vm13 = vcmp.gt.f32.partialorder %v452_v38, 0.0 }
 0x2b2   :  { %719 = vlog2.f32 %v454_v39 }
 0x2ba   :  { %v718_v40 = vpop.eup %717 }
 0x2bb   :  { %v438_v41 = vmul.f32 0.6931472, %v718_v40 }
 0x2bc   :  { %v720_v42 = vpop.eup %719 }
 0x2bd   :  { %v439_v43 = vadd.f32 %v438_v41, %v428_v17  ;;  %v456_v44 = vmul.f32 0.6931472, %v720_v42 }
 0x2bf   :  { %v440_v45 = vsel %vm435_vm12, %v439_v43, -inf  ;;  %v457_v46 = vadd.f32 %v456_v44, %v446_v20 }
 0x2c0   :  { %v459_v48 = vsub.f32 1.3862944, %v440_v45 }
 0x2c1   :  { %v458_v47 = vsel %vm453_vm13, %v457_v46, -inf }
 0x2c2   :  { %v460_v49 = vsub.f32 1.3862944, %v458_v47  ;;  %v462_v51 = vmul.f32 -2.0, %v459_v48 }
 0x2c4   :  { %v461_v50 = vmul.f32 0.6666667, %v460_v49 }
 0x2c6   :  { %v463_v52 = vmul.f32 -2.0, %v461_v50  ;;  %v479_v3 = vadd.f32 %v461_v50, %v459_v48 }
 0x2c8   :  { %v464_v53 = vmax.f32 %v462_v51, %v463_v52 }
 0x2ca   :  { %vm465_vm14 = vcmp.eq.f32.partialorder %v464_v53, -inf }
 0x2cb   :  { %v466_v54 = vsel %vm465_vm14, 0.0, %v464_v53 }
 0x2cc   :  { %v467_v55 = vsub.f32 %v462_v51, %v466_v54  ;;  %v470_v56 = vsub.f32 %v463_v52, %v466_v54 }
 0x2ce   :  { %v468_v57 = vmul.f32 1.442695, %v467_v55  ;;  %v471_v58 = vmul.f32 1.442695, %v470_v56 }
 0x2d0   :  { %721 = vpow2.f32 %v468_v57 }
 0x2d1   :  { %723 = vpow2.f32 %v471_v58 }
 0x2da   :  { %v722_v59 = vpop.eup %721 }
 0x2db   :  { %v724_v60 = vpop.eup %723 }
 0x2dc   :  { %v473_v61 = vadd.f32 %v724_v60, %v722_v59 }
 0x2de   :  { %725 = vlog2.f32 %v473_v61 }
 0x2e8   :  { %v726_v62 = vpop.eup %725 }
 0x2e9   :  { %v475_v63 = vmul.f32 0.6931472, %v726_v62 }
 0x2eb   :  { %v476_v1 = vadd.f32 %v475_v63, %v464_v53 }
 0x2ed   :  { %v477_v2 = vsub.f32 0.6931472, %v476_v1 }
 0x2ef   :  { %v478_v0 = vmul.f32 0.5, %v477_v2 }
 0x2f1   :  { %v480_v4 = vmul.f32 2.0, %v478_v0 }
 0x2f3   :  { %v481_v5 = vsub.f32 %v479_v3, %v480_v4 }
 0x2f5   :  { %482 = vst [vmem:[#allocation7] sm:$0xff] %v481_v5 }
 0x2f6   :  { %738 = shalt.err (!%p735_p4)
}
 0x2f7   :  { %s739_s24 = scalar_lea.hbm %s952_s3, 128 }
 0x2f8   :  { %p740_p5 = scmp.ne.s32.totalorder %s952_s3, %s739_s24  ;;  %p743_p6 = scmp.lt.u32.totalorder %s739_s24, %s952_s3 }
 0x2fa   :  { %p745_p7 = pnand %p743_p6, %p740_p5 }
 0x2fc   :  { %748 = shalt.err (!%p745_p7)
}
 0x2fd   :  { %492 = dma.vmem_to_hbm [thread:$0]  %s490_s2, 128, %s952_s3, [#allocation8]  }
 0x2fe   :  { %749 = dma.done.wait [#allocation8], 128  }
 0x2ff   :  { %750 = vsyncadd [#allocation8], 4294967168 }
 0x300   :  { %496 = vsyncpa [#allocation8], 1 }

</bundles_post_ra>
